<compile_context>
chip_gen: v7x
topology: tpu7x:2x2x1
jax: 0.10.0
libtpu: 0.0.40
codegen_flags: <defaults>
</compile_context>

<pallas_src>
import functools

import jax
import jax.numpy as jnp
from jax.experimental import pallas as pl
from jax.experimental.pallas import tpu as pltpu


def _ffn_kernel(x_ref, w1_ref, w2_ref, gamma_ref, beta_ref, o_ref, acc_ref, *, eps):
    # x_ref:     (block_rows, d_model)
    # w1_ref:    (d_model,   block_dff)   -- k-th chunk of W1
    # w2_ref:    (block_dff, d_model)     -- k-th chunk of W2
    # gamma_ref: (1, d_model), beta_ref: (1, d_model)
    # o_ref:     (block_rows, d_model)
    # acc_ref:   (block_rows, d_model) f32 scratch (resident across k)
    k = pl.program_id(1)
    nk = pl.num_programs(1)

    @pl.when(k == 0)
    def _():
        acc_ref[...] = jnp.zeros_like(acc_ref)

    # fc part 1: x @ W1_chunk  (native dtype on the MXU, f32 accumulation) + ReLU
    h = jnp.dot(x_ref[...], w1_ref[...], preferred_element_type=jnp.float32)
    h = jnp.maximum(h, 0.0)
    # fc part 2: accumulate the partial (rows, d_model) contribution of this chunk.
    acc_ref[...] += jnp.dot(h.astype(w2_ref.dtype), w2_ref[...],
                            preferred_element_type=jnp.float32)

    @pl.when(k == nk - 1)
    def _():
        # dropout (eval mode) is identity; residual add in f32.
        z = acc_ref[...] + x_ref[...].astype(jnp.float32)
        # LayerNorm over last dim (biased variance, PyTorch default eps=1e-5).
        mean = jnp.mean(z, axis=-1, keepdims=True)
        var = jnp.mean((z - mean) * (z - mean), axis=-1, keepdims=True)
        zn = (z - mean) * jax.lax.rsqrt(var + eps)
        gamma = gamma_ref[...].astype(jnp.float32)
        beta = beta_ref[...].astype(jnp.float32)
        o_ref[...] = (zn * gamma + beta).astype(o_ref.dtype)


def poswise_ffn(x, w1, w2, gamma, beta, *,
                block_rows=256, block_dff=2048, eps=1e-5):
    """x: [batch, seq, d_model] -> [batch, seq, d_model]."""
    batch, seq, d_model = x.shape
    d_ff = w1.shape[1]
    n_rows = batch * seq

    # Row tile: biggest multiple-of-8 tile that divides n_rows, capped at block_rows.
    block_rows = min(block_rows, n_rows)
    while n_rows % block_rows != 0:
        block_rows //= 2
    assert block_rows >= 1 and n_rows % block_rows == 0

    # d_ff chunk: either the full d_ff, or a lane-aligned chunk that divides it.
    if d_ff <= block_dff or d_ff % block_dff != 0 or block_dff % 128 != 0:
        block_dff = d_ff
    n_k = d_ff // block_dff

    x2 = x.reshape(n_rows, d_model)
    gamma2 = gamma.reshape(1, d_model)
    beta2 = beta.reshape(1, d_model)

    itm = jnp.dtype(x.dtype).itemsize
    wit = jnp.dtype(w1.dtype).itemsize

    # VMEM footprint estimate (double-buffered inputs/outputs + f32 scratch).
    io_tiles = 2 * 2 * block_rows * d_model * itm                      # x + out, 2-deep
    w_tiles = 2 * (d_model * block_dff + block_dff * d_model) * wit    # W1/W2 chunks, 2-deep
    scratch = block_rows * d_model * 4 + block_rows * block_dff * 4    # acc + h
    est = io_tiles + w_tiles + scratch + 2 * d_model * 4
    vmem_limit = min(max(int(est * 1.5), 32 << 20), 56 << 20)

    flops = 4 * n_rows * d_model * d_ff  # two matmuls, 2*M*K*N each
    bytes_accessed = (x2.size * itm + w1.size * wit + w2.size * wit +
                      (gamma2.size + beta2.size) * jnp.dtype(gamma.dtype).itemsize +
                      n_rows * d_model * itm)

    kernel = functools.partial(_ffn_kernel, eps=eps)

    out2 = pl.pallas_call(
        kernel,
        out_shape=jax.ShapeDtypeStruct((n_rows, d_model), x.dtype),
        grid_spec=pltpu.PrefetchScalarGridSpec(
            num_scalar_prefetch=0,
            grid=(n_rows // block_rows, n_k),
            in_specs=[
                pl.BlockSpec((block_rows, d_model), lambda i, k: (i, 0)),   # x rows
                pl.BlockSpec((d_model, block_dff), lambda i, k: (0, k)),    # W1 chunk
                pl.BlockSpec((block_dff, d_model), lambda i, k: (k, 0)),    # W2 chunk
                pl.BlockSpec((1, d_model), lambda i, k: (0, 0)),            # gamma
                pl.BlockSpec((1, d_model), lambda i, k: (0, 0)),            # beta
            ],
            out_specs=pl.BlockSpec((block_rows, d_model), lambda i, k: (i, 0)),
            scratch_shapes=[pltpu.VMEM((block_rows, d_model), jnp.float32)],
        ),
        compiler_params=pltpu.CompilerParams(
            dimension_semantics=("parallel", "arbitrary"),
            vmem_limit_bytes=vmem_limit),
        cost_estimate=pl.CostEstimate(
            flops=flops, transcendentals=n_rows, bytes_accessed=bytes_accessed),
    )(x2, w1, w2, gamma2, beta2)

    return out2.reshape(batch, seq, d_model)


if __name__ == "__main__":
    # Small, deterministic example: batch=2, seq=8, d_model=32, d_ff=64
    # (Production shapes should use d_model as a multiple of 128 for lane-dense
    #  stores; the kernel is correct either way.)
    batch, seq, d_model, d_ff = 2, 8, 32, 64

    key = jax.random.PRNGKey(0)
    kx, k1, k2 = jax.random.split(key, 3)

    x = jax.random.normal(kx, (batch, seq, d_model), dtype=jnp.float32)

    # Linear weights stored as (in, out) so the kernel computes x @ W directly.
    # (PyTorch stores (out, in) and computes x @ W.T — same math.)
    scale1 = 1.0 / (d_model ** 0.5)
    scale2 = 1.0 / (d_ff ** 0.5)
    w1 = jax.random.uniform(k1, (d_model, d_ff), jnp.float32, -scale1, scale1)
    w2 = jax.random.uniform(k2, (d_ff, d_model), jnp.float32, -scale2, scale2)

    # LayerNorm params: PyTorch default init (weight=1, bias=0)
    gamma = jnp.ones((d_model,), jnp.float32)
    beta = jnp.zeros((d_model,), jnp.float32)

    out = poswise_ffn(x, w1, w2, gamma, beta)
    out = jax.block_until_ready(out)

    # Sanity check against plain-JAX reference
    def ref(x):
        y = jnp.maximum(x @ w1, 0.0) @ w2
        z = y + x
        m = jnp.mean(z, axis=-1, keepdims=True)
        v = jnp.mean((z - m) ** 2, axis=-1, keepdims=True)
        return (z - m) / jnp.sqrt(v + 1e-5) * gamma + beta

    assert out.shape == (batch, seq, d_model)
    assert jnp.allclose(out, ref(x), atol=1e-5, rtol=1e-5)
    print("KERNEL_OK")
</pallas_src>

<mosaic_0001>
module attributes {stable_mosaic.version = 11 : i64} {
  func.func @_ffn_kernel(%arg0: i32, %arg1: i32, %arg2: memref<16x32xf32, #tpu.memory_space<vmem>>, %arg3: memref<32x64xf32, #tpu.memory_space<vmem>>, %arg4: memref<64x32xf32, #tpu.memory_space<vmem>>, %arg5: memref<1x32xf32, #tpu.memory_space<vmem>>, %arg6: memref<1x32xf32, #tpu.memory_space<vmem>>, %arg7: memref<16x32xf32, #tpu.memory_space<vmem>>, %arg8: memref<16x32xf32, #tpu.memory_space<vmem>>) attributes {dimension_semantics = [#tpu.dimension_semantics<parallel>, #tpu.dimension_semantics<arbitrary>], iteration_bounds = array<i64: 1, 1>, scalar_prefetch = 0 : i64, scratch_operands = 1 : i64, tpu.core_type = #tpu.core_type<tc>, window_params = [{transform_indices = @transform_0, window_bounds = array<i64: 16, 32>}, {transform_indices = @transform_1, window_bounds = array<i64: 32, 64>}, {transform_indices = @transform_2, window_bounds = array<i64: 64, 32>}, {pipeline_mode = #tpu.pipeline_mode<synchronous>, transform_indices = @transform_3, window_bounds = array<i64: 1, 32>}, {pipeline_mode = #tpu.pipeline_mode<synchronous>, transform_indices = @transform_4, window_bounds = array<i64: 1, 32>}, {transform_indices = @transform_5, window_bounds = array<i64: 16, 32>}]} {
    %c0_i32 = arith.constant 0 : i32
    %0 = arith.cmpi eq, %arg1, %c0_i32 : i32
    %1 = arith.extui %0 : i1 to i32
    %c0_i32_0 = arith.constant 0 : i32
    %2 = arith.cmpi ne, %1, %c0_i32_0 : i32
    scf.if %2 {
      %cst_14 = arith.constant 0.000000e+00 : f32
      %16 = vector.broadcast %cst_14 : f32 to vector<16x32xf32>
      %c0_15 = arith.constant 0 : index
      %c0_16 = arith.constant 0 : index
      %17 = vector.load %arg8[%c0_15, %c0_16] : memref<16x32xf32, #tpu.memory_space<vmem>>, vector<16x32xf32>
      tpu.vector_store %arg8[%c0_15, %c0_16], %16 {strides = array<i32>} : memref<16x32xf32, #tpu.memory_space<vmem>>, vector<16x32xf32>,
    } else {
    }
    %c0 = arith.constant 0 : index
    %c0_1 = arith.constant 0 : index
    %3 = vector.load %arg2[%c0, %c0_1] : memref<16x32xf32, #tpu.memory_space<vmem>>, vector<16x32xf32>
    %c0_2 = arith.constant 0 : index
    %c0_3 = arith.constant 0 : index
    %4 = vector.load %arg3[%c0_2, %c0_3] : memref<32x64xf32, #tpu.memory_space<vmem>>, vector<32x64xf32>
    %cst = arith.constant dense<0.000000e+00> : vector<16x64xf32>
    %5 = tpu.matmul %3, %4, %cst {dimension_numbers = #tpu.dot_dimension_numbers<[1], [0], [0], [1], [0, 0, 1, 1], [], []>} : vector<16x32xf32>, vector<32x64xf32>, vector<16x64xf32> -> vector<16x64xf32>
    %cst_4 = arith.constant 0.000000e+00 : f32
    %6 = vector.broadcast %cst_4 : f32 to vector<16x64xf32>
    %7 = arith.maximumf %5, %6 : vector<16x64xf32>
    %c0_5 = arith.constant 0 : index
    %c0_6 = arith.constant 0 : index
    %8 = vector.load %arg8[%c0_5, %c0_6] : memref<16x32xf32, #tpu.memory_space<vmem>>, vector<16x32xf32>
    %c0_7 = arith.constant 0 : index
    %c0_8 = arith.constant 0 : index
    %9 = vector.load %arg4[%c0_7, %c0_8] : memref<64x32xf32, #tpu.memory_space<vmem>>, vector<64x32xf32>
    %cst_9 = arith.constant dense<0.000000e+00> : vector<16x32xf32>
    %10 = tpu.matmul %7, %9, %cst_9 {dimension_numbers = #tpu.dot_dimension_numbers<[1], [0], [0], [1], [0, 0, 1, 1], [], []>} : vector<16x64xf32>, vector<64x32xf32>, vector<16x32xf32> -> vector<16x32xf32>
    %11 = arith.addf %8, %10 : vector<16x32xf32>
    %c0_10 = arith.constant 0 : index
    %c0_11 = arith.constant 0 : index
    %12 = vector.load %arg8[%c0_10, %c0_11] : memref<16x32xf32, #tpu.memory_space<vmem>>, vector<16x32xf32>
    tpu.vector_store %arg8[%c0_10, %c0_11], %11 {strides = array<i32>} : memref<16x32xf32, #tpu.memory_space<vmem>>, vector<16x32xf32>,
    %c0_i32_12 = arith.constant 0 : i32
    %13 = arith.cmpi eq, %arg1, %c0_i32_12 : i32
    %14 = arith.extui %13 : i1 to i32
    %c0_i32_13 = arith.constant 0 : i32
    %15 = arith.cmpi ne, %14, %c0_i32_13 : i32
    scf.if %15 {
      %c0_14 = arith.constant 0 : index
      %c0_15 = arith.constant 0 : index
      %16 = vector.load %arg8[%c0_14, %c0_15] : memref<16x32xf32, #tpu.memory_space<vmem>>, vector<16x32xf32>
      %c0_16 = arith.constant 0 : index
      %c0_17 = arith.constant 0 : index
      %17 = vector.load %arg2[%c0_16, %c0_17] : memref<16x32xf32, #tpu.memory_space<vmem>>, vector<16x32xf32>
      %18 = arith.addf %16, %17 : vector<16x32xf32>
      %cst_18 = arith.constant dense<0.000000e+00> : vector<16xf32>
      %19 = vector.multi_reduction <add>, %18, %cst_18 [1] : vector<16x32xf32> to vector<16xf32>
      %20 = vector.shape_cast %19 : vector<16xf32> to vector<16x1xf32>
      %cst_19 = arith.constant 3.200000e+01 : f32
      %21 = vector.broadcast %cst_19 : f32 to vector<16x1xf32>
      %22 = arith.divf %20, %21 : vector<16x1xf32>
      %23 = vector.broadcast %22 : vector<16x1xf32> to vector<16x32xf32>
      %24 = arith.subf %18, %23 : vector<16x32xf32>
      %25 = vector.broadcast %22 : vector<16x1xf32> to vector<16x32xf32>
      %26 = arith.subf %18, %25 : vector<16x32xf32>
      %27 = arith.mulf %24, %26 : vector<16x32xf32>
      %cst_20 = arith.constant dense<0.000000e+00> : vector<16xf32>
      %28 = vector.multi_reduction <add>, %27, %cst_20 [1] : vector<16x32xf32> to vector<16xf32>
      %29 = vector.shape_cast %28 : vector<16xf32> to vector<16x1xf32>
      %cst_21 = arith.constant 3.200000e+01 : f32
      %30 = vector.broadcast %cst_21 : f32 to vector<16x1xf32>
      %31 = arith.divf %29, %30 : vector<16x1xf32>
      %32 = vector.broadcast %22 : vector<16x1xf32> to vector<16x32xf32>
      %33 = arith.subf %18, %32 : vector<16x32xf32>
      %cst_22 = arith.constant 9.99999974E-6 : f32
      %34 = vector.broadcast %cst_22 : f32 to vector<16x1xf32>
      %35 = arith.addf %31, %34 : vector<16x1xf32>
      %36 = math.rsqrt %35 : vector<16x1xf32>
      %37 = vector.broadcast %36 : vector<16x1xf32> to vector<16x32xf32>
      %38 = arith.mulf %33, %37 : vector<16x32xf32>
      %c0_23 = arith.constant 0 : index
      %c0_24 = arith.constant 0 : index
      %39 = vector.load %arg5[%c0_23, %c0_24] : memref<1x32xf32, #tpu.memory_space<vmem>>, vector<1x32xf32>
      %c0_25 = arith.constant 0 : index
      %c0_26 = arith.constant 0 : index
      %40 = vector.load %arg6[%c0_25, %c0_26] : memref<1x32xf32, #tpu.memory_space<vmem>>, vector<1x32xf32>
      %41 = vector.broadcast %39 : vector<1x32xf32> to vector<16x32xf32>
      %42 = arith.mulf %38, %41 : vector<16x32xf32>
      %43 = vector.broadcast %40 : vector<1x32xf32> to vector<16x32xf32>
      %44 = arith.addf %42, %43 : vector<16x32xf32>
      %c0_27 = arith.constant 0 : index
      %c0_28 = arith.constant 0 : index
      %45 = vector.load %arg7[%c0_27, %c0_28] : memref<16x32xf32, #tpu.memory_space<vmem>>, vector<16x32xf32>
      tpu.vector_store %arg7[%c0_27, %c0_28], %44 {strides = array<i32>} : memref<16x32xf32, #tpu.memory_space<vmem>>, vector<16x32xf32>,
    } else {
    }
    return
  }
  func.func @transform_0(%arg0: i32, %arg1: i32) -> (i32, i32) {
    %c0_i32 = arith.constant 0 : i32
    %c0_i32_0 = arith.constant 0 : i32
    return %arg0, %c0_i32 : i32, i32
  }
  func.func @transform_1(%arg0: i32, %arg1: i32) -> (i32, i32) {
    %c0_i32 = arith.constant 0 : i32
    %c0_i32_0 = arith.constant 0 : i32
    return %c0_i32, %arg1 : i32, i32
  }
  func.func @transform_2(%arg0: i32, %arg1: i32) -> (i32, i32) {
    %c0_i32 = arith.constant 0 : i32
    %c0_i32_0 = arith.constant 0 : i32
    return %arg1, %c0_i32 : i32, i32
  }
  func.func @transform_3(%arg0: i32, %arg1: i32) -> (i32, i32) {
    %c0_i32 = arith.constant 0 : i32
    %c0_i32_0 = arith.constant 0 : i32
    %c0_i32_1 = arith.constant 0 : i32
    return %c0_i32, %c0_i32_0 : i32, i32
  }
  func.func @transform_4(%arg0: i32, %arg1: i32) -> (i32, i32) {
    %c0_i32 = arith.constant 0 : i32
    %c0_i32_0 = arith.constant 0 : i32
    %c0_i32_1 = arith.constant 0 : i32
    return %c0_i32, %c0_i32_0 : i32, i32
  }
  func.func @transform_5(%arg0: i32, %arg1: i32) -> (i32, i32) {
    %c0_i32 = arith.constant 0 : i32
    %c0_i32_0 = arith.constant 0 : i32
    return %arg0, %c0_i32 : i32, i32
  }
}

</mosaic_0001>

<bundles_post_ra>
// kernel: tpu_custom_call.1
= control target key start
LH: loop header
LB: loop body
LE: loop exit
PB: predicated region body
PF: predicated region fallthrough
CT: control target
= control target key end

     0   :  { %vm25_vm0 = vcmask 261120   ;;  %s500_s0 = inlined_call_operand.vmem [shape: f32[16,32], index: 0, kind: input, shape index: {}]   ;;  %s501_s1 = inlined_call_operand.vmem [shape: f32[32,64], index: 1, kind: input, shape index: {}]   ;;  %s502_s2 = inlined_call_operand.vmem [shape: f32[64,32], index: 2, kind: input, shape index: {}]   ;;  %s503_s3 = inlined_call_operand.vmem [shape: f32[1,32], index: 3, kind: input, shape index: {}]   ;;  %s504_s4 = inlined_call_operand.vmem [shape: f32[1,32], index: 4, kind: input, shape index: {}]   ;;  %s505_s5 = inlined_call_operand.hbm [shape: f32[16,32], index: 5, kind: output, shape index: {}]  }
   0x1   :  { %v30_v0 = vld [vmem:[%s501_s1] sm:$0xff]  ;;  %v31_v1 = vld [vmem:[%s501_s1 + $0x8] sm:$0xff]  ;;  %v32_v2 = vld [vmem:[%s501_s1 + $0x10] sm:$0xff] }
   0x2   :  { %v338_v3 = vpack.c.bf16 %v31_v1, %v30_v0  ;;  %v33_v4 = vld [vmem:[%s501_s1 + $0x18] sm:$0xff]  ;;  %v28_v5 = vld [vmem:[%s500_s0] sm:$0xff]  ;;  %v121_v8 = vld [vmem:[%s502_s2 + $0x8] sm:$0xff] }
   0x3   :  { %v342_v6 = vpack.c.bf16 %v33_v4, %v32_v2  ;;  %316 = vmatprep.mubr.msk.f32.mxu0 %vm25_vm0, %v28_v5  ;;  %v120_v7 = vld [vmem:[%s502_s2] sm:$0xff]  ;;  %v122_v9 = vld [vmem:[%s502_s2 + $0x10] sm:$0xff]  ;;  %v123_v11 = vld [vmem:[%s502_s2 + $0x18] sm:$0xff] }
   0x4   :  { %339 = vmatprep.subr.bf16.mxu0 %v338_v3  ;;  %v346_v10 = vpack.c.bf16 %v121_v8, %v120_v7  ;;  %v350_v12 = vpack.c.bf16 %v123_v11, %v122_v9  ;;  %v124_v13 = vld [vmem:[%s502_s2 + $0x20] sm:$0xff]  ;;  %v125_v14 = vld [vmem:[%s502_s2 + $0x28] sm:$0xff] }
   0x5   :  { %341 = vmatpush3.bf16.msra.mxu0 %v338_v3 }
   0x6   :  { %10 = vsyncpa [#allocation4], 0  ;;  %343 = vmatprep.subr.bf16.mxu0 %v342_v6  ;;  %347 = vmatprep.subr.bf16.mxu1 %v346_v10  ;;  %v354_v15 = vpack.c.bf16 %v125_v14, %v124_v13  ;;  %v29_v16 = vld [vmem:[%s500_s0 + $0x8] sm:$0xff]  ;;  %v126_v17 = vld [vmem:[%s502_s2 + $0x30] sm:$0xff]  ;;  %v394_v20 = vmov 0.0   ;;  %vm128_vm1 = vcmask 523264  }
   0x7   :  { %349 = vmatpush3.bf16.msra.mxu1 %v346_v10  ;;  %v127_v18 = vld [vmem:[%s502_s2 + $0x38] sm:$0xff]  ;;  %27 = vst.msk [vmem:[#allocation2 + $0x8] sm:$0xff] %vm25_vm0, %v394_v20  ;;  %26 = vst.msk [vmem:[#allocation2] sm:$0xff] %vm25_vm0, %v394_v20  ;;  %v290_v54 = vld [vmem:[%s503_s3] ss:$0 sm:$0xff]  ;;  %s395_s22 = smov [#allocation3]  }
   0x8   :  { %351 = vmatprep.subr.bf16.mxu1 %v350_v12  ;;  %v358_v19 = vpack.c.bf16 %v127_v18, %v126_v17  ;;  %v291_v56 = vld [vmem:[%s504_s4] ss:$0 sm:$0xff]  ;;  %s275_s23 = sshll.u32 %s395_s22, 4  ;;  %s276_s23 = int_to_ptr.vmem [resolvable:$true] %s275_s23 }
   0x9   :  { %345 = vmatpush3.bf16.msra.mxu0 %v342_v6  ;;  %s370_s24 = scalar_lea.vmem %s276_s23, 256  ;;  %p375_p1 = scmp.lt.s32.totalorder %s276_s23, %s276_s23 }
   0xa   :  { %p371_p0 = scmp.ne.s32.totalorder %s276_s23, %s370_s24  ;;  %p376_p2 = scmp.lt.s32.totalorder %s370_s24, %s370_s24 }
   0xb   :  { %353 = vmatpush3.bf16.msra.mxu1 %v350_v12 }
   0xc   :  { %317 = vmatmul.mubr.msk.f32.vlgmr.msra.gmra.mrb[0].mxu0 %vm25_vm0, %v29_v16  ;;  %355 = vmatprep.subr.bf16.mxu1 %v354_v15  ;;  %p377_p3 = por %p376_p2, %p375_p1 }
   0xe   :  { %v119_v25 = vld [vmem:[#allocation2 + $0x8] sm:$0xff]  ;;  %v118_v26 = vld [vmem:[#allocation2] sm:$0xff]  ;;  %p378_p4 = pnand %p377_p3, %p371_p0 }
   0xf   :  { %357 = vmatpush3.bf16.msra.mxu1 %v354_v15 }
  0x10   :  { %359 = vmatprep.subr.bf16.mxu1 %v358_v19 }
  0x13   :  { %361 = vmatpush3.bf16.msra.mxu1 %v358_v19 }
  0xdf   :  { %v318_v21 = vpop.f32.mrb[0].mxu0 }
  0xe0   :  { %v107_v22 = vpop.f32.mrb[1].mxu0  ;;  %v117_v24 = vmax.f32 %v318_v21, 0.0 }
  0xe1   :  { %v116_v23 = vmax.f32 %v107_v22, 0.0 }
  0xe3   :  { %335 = vmatprep.mubr.msk.f32.mxu1 %vm128_vm1, %v116_v23 }
  0xe4   :  { %336 = vmatmul.mubr.msk.f32.vlgmr.msra.gmra.mrb[0].mxu1 %vm128_vm1, %v117_v24 }
 0x1b7   :  { %v337_v27 = vpop.f32.mrb[0].mxu1 }
 0x1b8   :  { %v211_v28 = vadd.f32 %v337_v27, %v119_v25  ;;  %v201_v29 = vpop.f32.mrb[1].mxu1 }
 0x1b9   :  { %v210_v30 = vadd.f32 %v201_v29, %v118_v26 }
 0x1ba   :  { %213 = vst.msk [vmem:[#allocation2 + $0x8] sm:$0xff] %vm25_vm0, %v211_v28 }
 0x1bb   :  { %212 = vst.msk [vmem:[#allocation2] sm:$0xff] %vm25_vm0, %v210_v30 }
 0x1c1   :  { %v218_v32 = vld [vmem:[#allocation2 + $0x8] sm:$0xff] }
 0x1c2   :  { %v217_v31 = vld [vmem:[#allocation2] sm:$0xff]  ;;  %v222_v35 = vadd.f32 %v218_v32, %v29_v16 }
 0x1c3   :  { %v221_v33 = vadd.f32 %v217_v31, %v28_v5 }
 0x1c4   :  { %v226_v36 = vsel %vm25_vm0, %v222_v35, 0.0 }
 0x1c5   :  { %v223_v34 = vsel %vm25_vm0, %v221_v33, 0.0 }
 0x1c6   :  { %224 = vadd.xlane.f32.xlu0 %v223_v34 }
 0x1ca   :  { %227 = vadd.xlane.f32.xlu0 %v226_v36 }
 0x253   :  { %v225_v37 = vpop.xlane.xlu0 %224 }
 0x254   :  { %v230_v38 = vmul.f32 0.03125, %v225_v37 }
 0x256   :  { %v232_v39 = vsub.f32 %v221_v33, %v230_v38 }
 0x257   :  { %v228_v40 = vpop.xlane.xlu0 %227 }
 0x258   :  { %v231_v41 = vmul.f32 0.03125, %v228_v40  ;;  %v234_v42 = vmul.f32 %v232_v39, %v232_v39 }
 0x25a   :  { %v233_v43 = vsub.f32 %v222_v35, %v231_v41  ;;  %v236_v44 = vsel %vm25_vm0, %v234_v42, 0.0 }
 0x25b   :  { %237 = vadd.xlane.f32.xlu1 %v236_v44 }
 0x25c   :  { %v235_v45 = vmul.f32 %v233_v43, %v233_v43 }
 0x25e   :  { %v239_v46 = vsel %vm25_vm0, %v235_v45, 0.0 }
 0x25f   :  { %240 = vadd.xlane.f32.xlu1 %v239_v46 }
 0x2e8   :  { %v238_v47 = vpop.xlane.xlu1 %237 }
 0x2e9   :  { %v242_v48 = vmul.f32 0.03125, %v238_v47 }
 0x2eb   :  { %v244_v49 = vadd.f32 1e-05, %v242_v48 }
 0x2ec   :  { %v241_v50 = vpop.xlane.xlu1 %240 }
 0x2ed   :  { %366 = vrsqrt.f32 %v244_v49  ;;  %v243_v51 = vmul.f32 0.03125, %v241_v50 }
 0x2ef   :  { %v245_v52 = vadd.f32 1e-05, %v243_v51 }
 0x2f1   :  { %368 = vrsqrt.f32 %v245_v52 }
 0x2f7   :  { %v367_v53 = vpop.eup %366 }
 0x2f8   :  { %v248_v55 = vmul.f32 %v367_v53, %v232_v39 }
 0x2fa   :  { %v258_v57 = vmul.f32 %v290_v54, %v248_v55 }
 0x2fb   :  { %v369_v58 = vpop.eup %368 }
 0x2fc   :  { %v249_v59 = vmul.f32 %v369_v58, %v233_v43  ;;  %v266_v60 = vadd.f32 %v291_v56, %v258_v57 }
 0x2fe   :  { %v259_v61 = vmul.f32 %v290_v54, %v249_v59  ;;  %268 = vst.msk [vmem:[#allocation3] sm:$0xff] %vm25_vm0, %v266_v60 }
 0x300   :  { %v267_v62 = vadd.f32 %v291_v56, %v259_v61 }
 0x302   :  { %269 = vst.msk [vmem:[#allocation3 + $0x8] sm:$0xff] %vm25_vm0, %v267_v62 }
 0x303   :  { %381 = shalt.err (!%p378_p4)
}
 0x304   :  { %s382_s25 = scalar_lea.hbm %s505_s5, 256 }
 0x305   :  { %p383_p5 = scmp.ne.s32.totalorder %s505_s5, %s382_s25  ;;  %p386_p6 = scmp.lt.u32.totalorder %s382_s25, %s505_s5 }
 0x307   :  { %p388_p7 = pnand %p386_p6, %p383_p5 }
 0x309   :  { %391 = shalt.err (!%p388_p7)
}
 0x30a   :  { %s396_s30 = smov 128   ;;  %s397_s6 = smov 8  }
 0x30b   :  { %281 = dma.vmem_to_hbm [thread:$0]  %s276_s23, 256, %s505_s5, [#allocation4], %s396_s30, %s396_s30, %s397_s6  }
 0x30c   :  { %392 = dma.done.wait [#allocation4], 256  }
 0x30d   :  { %393 = vsyncadd [#allocation4], 4294967040 }
 0x30e   :  { %285 = vsyncpa [#allocation4], 1 }

</bundles_post_ra>
